<compile_context>
chip_gen: v7x
topology: tpu7x:2x2x1
jax: 0.10.0
libtpu: 0.0.40
codegen_flags: <defaults>
</compile_context>

<pallas_src>
import jax
import jax.numpy as jnp
from jax import lax
from jax.experimental import pallas as pl
from jax.experimental.pallas import tpu as pltpu


def _mlp_kernel(x_ref, w1_ref, b1_ref, w2_ref, b2_ref, w3_ref, b3_ref, o_ref):
    # x: (tb, n_features) -- batch on sublanes, exactly as stored in HBM.
    x = x_ref[...]

    # Layer 1: Linear(n_features, 6) + ReLU.  Contract on n_features so the
    # result is batch-on-lanes (6, tb); the MXU does the matmul, any operand
    # re-layout is XLU work hidden under the (bandwidth-bound) input DMA.
    h1 = lax.dot_general(
        w1_ref[...], x,
        dimension_numbers=(((1,), (1,)), ((), ())),
        preferred_element_type=jnp.float32,
    ) + b1_ref[...]
    h1 = jnp.maximum(h1, 0.0)

    # Layer 2: Linear(6, 6) + ReLU            -> (6, tb)
    h2 = jnp.dot(w2_ref[...], h1, preferred_element_type=jnp.float32) + b2_ref[...]
    h2 = jnp.maximum(h2, 0.0)

    # Layer 3: Linear(6, 1) on the VPU/XLU: broadcast-multiply + sublane
    # reduce (avoids an MXU op with a single useful output column).
    z = jnp.sum(h2 * w3_ref[...], axis=0, keepdims=True) + b3_ref[...]  # (1, tb)

    # Sigmoid (exp on the EUP slot); lane-dense (1, tb) store.
    o_ref[...] = jax.nn.sigmoid(z).astype(o_ref.dtype)


def _round_up(n, m):
    return ((n + m - 1) // m) * m


def _round_down(n, m):
    return (n // m) * m


def _select_batch_tile(B, n_features, itemsize):
    """Lane-aligned batch tile sized so the x block is multi-MiB."""
    # Per-generation x-block target: v5e/v6e have 128 MiB VMEM (8 MiB blocks),
    # v7x only 64 MiB (4 MiB blocks).  Fall back to the conservative value.
    target_bytes = 4 * 1024 * 1024
    try:
        if pltpu.get_tpu_info().vmem_capacity_bytes >= 96 * 1024 * 1024:
            target_bytes = 8 * 1024 * 1024
    except Exception:
        pass

    if B < 128:
        # Exact single block (block dims equal full array dims): no padding,
        # no masking, one grid step.
        return B

    tb = max(128, _round_down(target_bytes // (itemsize * n_features), 128))
    if B >= 256:
        # Guarantee >= 2 grid steps so the 'parallel' axis shards across both
        # v7x TensorCores.
        tb = min(tb, _round_up(-(-B // 2), 128))
    # Never DMA/compute a whole wasted tile past the batch.
    tb = min(tb, _round_up(B, 128))
    return tb


def classifier_forward(x, params):
    """x: (B, n_features).  params: PyTorch-shaped weights/biases.

    w1: (6, n_features), b1: (6,), w2: (6, 6), b2: (6,), w3: (1, 6), b3: (1,)
    Returns (B, 1) in x.dtype.
    """
    B, n_features = x.shape
    w1, b1 = params["w1"], params["b1"]
    w2, b2 = params["w2"], params["b2"]
    w3, b3 = params["w3"], params["b3"]

    # Match weight dtype to the activation dtype (e.g. bf16 inputs); the MXU
    # accumulate stays f32 via preferred_element_type.
    dt = x.dtype
    w1 = w1.astype(dt)
    w2 = w2.astype(dt)
    w3 = w3.astype(dt)

    # Biases as (out, 1) columns so they broadcast along lanes; w3 as (6, 1).
    b1c = b1.reshape(6, 1).astype(jnp.float32)
    b2c = b2.reshape(6, 1).astype(jnp.float32)
    w3c = w3.reshape(6, 1)
    b3c = b3.reshape(1, 1).astype(jnp.float32)

    tb = _select_batch_tile(B, n_features, dt.itemsize)
    grid = (pl.cdiv(B, tb),)

    out = pl.pallas_call(
        _mlp_kernel,
        out_shape=jax.ShapeDtypeStruct((1, B), dt),
        grid=grid,
        in_specs=[
            pl.BlockSpec((tb, n_features), lambda i: (i, 0)),   # x tile (as stored)
            pl.BlockSpec(w1.shape, lambda i: (0, 0)),           # weights stay
            pl.BlockSpec((6, 1), lambda i: (0, 0)),             # VMEM-resident
            pl.BlockSpec((6, 6), lambda i: (0, 0)),
            pl.BlockSpec((6, 1), lambda i: (0, 0)),
            pl.BlockSpec((6, 1), lambda i: (0, 0)),
            pl.BlockSpec((1, 1), lambda i: (0, 0)),
        ],
        out_specs=pl.BlockSpec((1, tb), lambda i: (0, i)),      # lane-dense out
        compiler_params=pltpu.CompilerParams(
            dimension_semantics=("parallel",),
            vmem_limit_bytes=48 * 1024 * 1024,
        ),
    )(x, w1, b1c, w2, b2c, w3c, b3c)

    # PyTorch-shaped (B, 1) result; (1, B) -> (B, 1) is a trivial reshape.
    return out.T


def init_params(n_features, key):
    """PyTorch-style init and shapes: weight (out, in), bias (out,)."""
    ks = jax.random.split(key, 6)

    def lin(kw, kb, fan_in, fan_out):
        bound = 1.0 / (fan_in ** 0.5)
        w = jax.random.uniform(kw, (fan_out, fan_in), jnp.float32, -bound, bound)
        b = jax.random.uniform(kb, (fan_out,), jnp.float32, -bound, bound)
        return w, b

    w1, b1 = lin(ks[0], ks[1], n_features, 6)
    w2, b2 = lin(ks[2], ks[3], 6, 6)
    w3, b3 = lin(ks[4], ks[5], 6, 1)
    return {"w1": w1, "b1": b1, "w2": w2, "b2": b2, "w3": w3, "b3": b3}


def _reference(x, p):
    h1 = jnp.maximum(x @ p["w1"].T + p["b1"], 0.0)
    h2 = jnp.maximum(h1 @ p["w2"].T + p["b2"], 0.0)
    return jax.nn.sigmoid(h2 @ p["w3"].T + p["b3"])


if __name__ == "__main__":
    key = jax.random.PRNGKey(0)
    k_x, k_p = jax.random.split(key)

    batch, n_features = 8, 32
    x = jax.random.normal(k_x, (batch, n_features), jnp.float32)
    params = init_params(n_features, k_p)

    out = classifier_forward(x, params)
    out = jax.block_until_ready(out)

    ref = _reference(x, params)
    assert out.shape == (batch, 1), out.shape
    assert jnp.allclose(out, ref, atol=3e-5, rtol=3e-5), (out, ref)

    print("KERNEL_OK")
</pallas_src>

<mosaic_0001>
module attributes {stable_mosaic.version = 11 : i64} {
  func.func @_mlp_kernel(%arg0: i32, %arg1: memref<8x32xf32, #tpu.memory_space<vmem>>, %arg2: memref<6x32xf32, #tpu.memory_space<vmem>>, %arg3: memref<6x1xf32, #tpu.memory_space<vmem>>, %arg4: memref<6x6xf32, #tpu.memory_space<vmem>>, %arg5: memref<6x1xf32, #tpu.memory_space<vmem>>, %arg6: memref<6x1xf32, #tpu.memory_space<vmem>>, %arg7: memref<1x1xf32, #tpu.memory_space<vmem>>, %arg8: memref<1x8xf32, #tpu.memory_space<vmem>>) attributes {dimension_semantics = [#tpu.dimension_semantics<parallel>], iteration_bounds = array<i64: 1>, scalar_prefetch = 0 : i64, scratch_operands = 0 : i64, tpu.core_type = #tpu.core_type<tc>, window_params = [{transform_indices = @transform_0, window_bounds = array<i64: 8, 32>}, {pipeline_mode = #tpu.pipeline_mode<synchronous>, transform_indices = @transform_1, window_bounds = array<i64: 6, 32>}, {pipeline_mode = #tpu.pipeline_mode<synchronous>, transform_indices = @transform_2, window_bounds = array<i64: 6, 1>}, {pipeline_mode = #tpu.pipeline_mode<synchronous>, transform_indices = @transform_3, window_bounds = array<i64: 6, 6>}, {pipeline_mode = #tpu.pipeline_mode<synchronous>, transform_indices = @transform_4, window_bounds = array<i64: 6, 1>}, {pipeline_mode = #tpu.pipeline_mode<synchronous>, transform_indices = @transform_5, window_bounds = array<i64: 6, 1>}, {pipeline_mode = #tpu.pipeline_mode<synchronous>, transform_indices = @transform_6, window_bounds = array<i64: 1, 1>}, {transform_indices = @transform_7, window_bounds = array<i64: 1, 8>}]} {
    %c0 = arith.constant 0 : index
    %c0_0 = arith.constant 0 : index
    %0 = vector.load %arg1[%c0, %c0_0] : memref<8x32xf32, #tpu.memory_space<vmem>>, vector<8x32xf32>
    %c0_1 = arith.constant 0 : index
    %c0_2 = arith.constant 0 : index
    %1 = vector.load %arg2[%c0_1, %c0_2] : memref<6x32xf32, #tpu.memory_space<vmem>>, vector<6x32xf32>
    %cst = arith.constant dense<0.000000e+00> : vector<6x8xf32>
    %2 = tpu.matmul %1, %0, %cst {dimension_numbers = #tpu.dot_dimension_numbers<[1], [1], [0], [0], [0, 0, 1, 0], [], []>} : vector<6x32xf32>, vector<8x32xf32>, vector<6x8xf32> -> vector<6x8xf32>
    %c0_3 = arith.constant 0 : index
    %c0_4 = arith.constant 0 : index
    %3 = vector.load %arg3[%c0_3, %c0_4] : memref<6x1xf32, #tpu.memory_space<vmem>>, vector<6x1xf32>
    %4 = vector.broadcast %3 : vector<6x1xf32> to vector<6x8xf32>
    %5 = arith.addf %2, %4 : vector<6x8xf32>
    %cst_5 = arith.constant 0.000000e+00 : f32
    %6 = vector.broadcast %cst_5 : f32 to vector<6x8xf32>
    %7 = arith.maximumf %5, %6 : vector<6x8xf32>
    %c0_6 = arith.constant 0 : index
    %c0_7 = arith.constant 0 : index
    %8 = vector.load %arg4[%c0_6, %c0_7] : memref<6x6xf32, #tpu.memory_space<vmem>>, vector<6x6xf32>
    %cst_8 = arith.constant dense<0.000000e+00> : vector<6x8xf32>
    %9 = tpu.matmul %8, %7, %cst_8 {dimension_numbers = #tpu.dot_dimension_numbers<[1], [0], [0], [1], [0, 0, 1, 1], [], []>} : vector<6x6xf32>, vector<6x8xf32>, vector<6x8xf32> -> vector<6x8xf32>
    %c0_9 = arith.constant 0 : index
    %c0_10 = arith.constant 0 : index
    %10 = vector.load %arg5[%c0_9, %c0_10] : memref<6x1xf32, #tpu.memory_space<vmem>>, vector<6x1xf32>
    %11 = vector.broadcast %10 : vector<6x1xf32> to vector<6x8xf32>
    %12 = arith.addf %9, %11 : vector<6x8xf32>
    %cst_11 = arith.constant 0.000000e+00 : f32
    %13 = vector.broadcast %cst_11 : f32 to vector<6x8xf32>
    %14 = arith.maximumf %12, %13 : vector<6x8xf32>
    %c0_12 = arith.constant 0 : index
    %c0_13 = arith.constant 0 : index
    %15 = vector.load %arg6[%c0_12, %c0_13] : memref<6x1xf32, #tpu.memory_space<vmem>>, vector<6x1xf32>
    %16 = vector.broadcast %15 : vector<6x1xf32> to vector<6x8xf32>
    %17 = arith.mulf %14, %16 : vector<6x8xf32>
    %cst_14 = arith.constant dense<0.000000e+00> : vector<8xf32>
    %18 = vector.multi_reduction <add>, %17, %cst_14 [0] : vector<6x8xf32> to vector<8xf32>
    %19 = vector.shape_cast %18 : vector<8xf32> to vector<1x8xf32>
    %c0_15 = arith.constant 0 : index
    %c0_16 = arith.constant 0 : index
    %20 = vector.load %arg7[%c0_15, %c0_16] : memref<1x1xf32, #tpu.memory_space<vmem>>, vector<1x1xf32>
    %21 = vector.broadcast %20 : vector<1x1xf32> to vector<1x8xf32>
    %22 = arith.addf %19, %21 : vector<1x8xf32>
    %23 = arith.negf %22 : vector<1x8xf32>
    %24 = math.exp %23 : vector<1x8xf32>
    %cst_17 = arith.constant 1.000000e+00 : f32
    %25 = vector.broadcast %cst_17 : f32 to vector<1x8xf32>
    %26 = arith.addf %25, %24 : vector<1x8xf32>
    %27 = arith.divf %25, %26 : vector<1x8xf32>
    %c0_18 = arith.constant 0 : index
    %c0_19 = arith.constant 0 : index
    %28 = vector.load %arg8[%c0_18, %c0_19] : memref<1x8xf32, #tpu.memory_space<vmem>>, vector<1x8xf32>
    tpu.vector_store %arg8[%c0_18, %c0_19], %27 {strides = array<i32>} : memref<1x8xf32, #tpu.memory_space<vmem>>, vector<1x8xf32>,
    return
  }
  func.func @transform_0(%arg0: i32) -> (i32, i32) {
    %c0_i32 = arith.constant 0 : i32
    %c0_i32_0 = arith.constant 0 : i32
    return %arg0, %c0_i32 : i32, i32
  }
  func.func @transform_1(%arg0: i32) -> (i32, i32) {
    %c0_i32 = arith.constant 0 : i32
    %c0_i32_0 = arith.constant 0 : i32
    %c0_i32_1 = arith.constant 0 : i32
    return %c0_i32, %c0_i32_0 : i32, i32
  }
  func.func @transform_2(%arg0: i32) -> (i32, i32) {
    %c0_i32 = arith.constant 0 : i32
    %c0_i32_0 = arith.constant 0 : i32
    %c0_i32_1 = arith.constant 0 : i32
    return %c0_i32, %c0_i32_0 : i32, i32
  }
  func.func @transform_3(%arg0: i32) -> (i32, i32) {
    %c0_i32 = arith.constant 0 : i32
    %c0_i32_0 = arith.constant 0 : i32
    %c0_i32_1 = arith.constant 0 : i32
    return %c0_i32, %c0_i32_0 : i32, i32
  }
  func.func @transform_4(%arg0: i32) -> (i32, i32) {
    %c0_i32 = arith.constant 0 : i32
    %c0_i32_0 = arith.constant 0 : i32
    %c0_i32_1 = arith.constant 0 : i32
    return %c0_i32, %c0_i32_0 : i32, i32
  }
  func.func @transform_5(%arg0: i32) -> (i32, i32) {
    %c0_i32 = arith.constant 0 : i32
    %c0_i32_0 = arith.constant 0 : i32
    %c0_i32_1 = arith.constant 0 : i32
    return %c0_i32, %c0_i32_0 : i32, i32
  }
  func.func @transform_6(%arg0: i32) -> (i32, i32) {
    %c0_i32 = arith.constant 0 : i32
    %c0_i32_0 = arith.constant 0 : i32
    %c0_i32_1 = arith.constant 0 : i32
    return %c0_i32, %c0_i32_0 : i32, i32
  }
  func.func @transform_7(%arg0: i32) -> (i32, i32) {
    %c0_i32 = arith.constant 0 : i32
    %c0_i32_0 = arith.constant 0 : i32
    return %c0_i32, %arg0 : i32, i32
  }
}

</mosaic_0001>

<bundles_post_ra>
// kernel: tpu_custom_call.1
= control target key start
LH: loop header
LB: loop body
LE: loop exit
PB: predicated region body
PF: predicated region fallthrough
CT: control target
= control target key end

     0   :  { %s381_s0 = inlined_call_operand.vmem [shape: f32[8,32], index: 0, kind: input, shape index: {}]   ;;  %s382_s1 = inlined_call_operand.vmem [shape: f32[6,32], index: 1, kind: input, shape index: {}]   ;;  %s383_s2 = inlined_call_operand.vmem [shape: f32[6,1], index: 2, kind: input, shape index: {}]   ;;  %s384_s3 = inlined_call_operand.vmem [shape: f32[6,6], index: 3, kind: input, shape index: {}]   ;;  %s385_s4 = inlined_call_operand.vmem [shape: f32[6,1], index: 4, kind: input, shape index: {}]   ;;  %s386_s5 = inlined_call_operand.vmem [shape: f32[6,1], index: 5, kind: input, shape index: {}]   ;;  %s387_s6 = inlined_call_operand.<no memory space> [shape: f32[1,1], index: 6, kind: input, shape index: {}]   ;;  %s388_s7 = inlined_call_operand.hbm [shape: f32[1,8], index: 7, kind: output, shape index: {}]  }
   0x1   :  { %v12_v0 = vstv %s387_s6 }
   0x2   :  { %13 = vst [vmem:[#allocation2] sm:$0x1] %v12_v0 }
   0x3   :  { %v29_v1 = vld [vmem:[%s381_s0] sm:$0xff]  ;;  %vm37_vm0 = vcmask 261120   ;;  %v302_v2 = vmov 0.0   ;;  %vm303_vm1 = vmmov 0   ;;  %v304_v5 = vmov 0  }
   0x4   :  { %258 = vmatprep.subr.mxu0 %v302_v2  ;;  %260 = vmatprep.mubr.msk.f32.mxu0 %vm303_vm1, %v302_v2  ;;  %v31_v3 = vld [vmem:[%s383_s2] sm:$0x3f] }
   0x5   :  { %259 = vmatpush3.xpose.msk.msra.mxu0 %vm37_vm0, %v29_v1  ;;  %v30_v4 = vld [vmem:[%s382_s1] sm:$0x3f]  ;;  %272 = vset.pattern.permute.xlu0 %v304_v5 }
   0x6   :  { %14 = vsyncpa [#allocation4], 0  ;;  %34 = vperm.xlu0 %272, %v31_v3   ;;  %263 = vmatprep.subr.mxu1 %v302_v2  ;;  %v116_v6 = vld [vmem:[%s385_s4] sm:$0x3f]  ;;  %vm126_vm2 = vcmask 1045504   ;;  %vm122_vm3 = vcmask 48128   ;;  %v222_v22 = vlaneseq }
   0x7   :  { %265 = vmatprep.mubr.msk.f32.mxu1 %vm303_vm1, %v302_v2  ;;  %273 = vset.pattern.permute.xlu1 %v304_v5  ;;  %v201_v7 = vld [vmem:[%s386_s5] sm:$0x3f]  ;;  %vm208_vm4 = vcmask 62464   ;;  %vm233_vm5 = vcmask 57344  }
   0x8   :  { %261 = vmatmul.mubr.msk.f32.vlgmr.msra.gmra.mrb[0].mxu0 %vm37_vm0, %v30_v4  ;;  %204 = vperm.xlu1 %273, %v201_v7   ;;  %v115_v14 = vld [vmem:[%s384_s3] sm:$0x3f]  ;;  %v223_v26 = vshrl.u32 %v222_v22, 7  ;;  %s305_s3 = smov [#allocation3]  }
   0x9   :  { %v216_v8 = vld [vmem:[#allocation2] sm:$0x1]  ;;  %s241_s5 = sshll.u32 %s305_s3, 4  ;;  %s242_s5 = int_to_ptr.vmem [resolvable:$true] %s241_s5 }
   0xa   :  { %119 = vperm.xlu0 %272, %v116_v6   ;;  %v224_v28 = vsub.s32 0, %v223_v26  ;;  %s278_s10 = scalar_lea.vmem %s242_s5, 16  ;;  %s282_s11 = scalar_lea.vmem %s242_s5, 32 }
   0xb   :  { %p279_p0 = scmp.ne.s32.totalorder %s242_s5, %s278_s10  ;;  %p283_p1 = scmp.lt.s32.totalorder %s242_s5, %s242_s5 }
   0xc   :  { %219 = vperm.xlu1 %273, %v216_v8   ;;  %p284_p2 = scmp.lt.s32.totalorder %s282_s11, %s278_s10 }
   0xe   :  { %p285_p3 = por %p284_p2, %p283_p1 }
  0x10   :  { %p286_p4 = pnand %p285_p3, %p279_p0 }
  0x85   :  { %v35_v9 = vpop.permute.xlu0 %34 }
  0x87   :  { %v205_v20 = vpop.permute.xlu1 %204 }
  0x89   :  { %v120_v15 = vpop.permute.xlu0 %119 }
  0x8b   :  { %v220_v30 = vpop.permute.xlu1 %219 }
  0x8c   :  { %v225_v33 = vrot.slane %v220_v30, %v224_v28 }
  0xdb   :  { %v110_v10 = vpop.f32.mrb[0].mxu0 }
  0xdc   :  { %v111_v11 = vadd.f32 %v110_v10, %v35_v9  ;;  %v262_v12 = vpop.f32.mrb[1].mxu0 }
  0xde   :  { %v114_v13 = vmax.f32 %v111_v11, 0.0 }
  0xe0   :  { %264 = vmatpush3.msk.msra.mxu1 %vm126_vm2, %v114_v13 }
  0xe1   :  { %266 = vmatmul.mubr.msk.f32.vlgmr.msra.gmra.mrb[0].mxu1 %vm122_vm3, %v115_v14 }
 0x1b4   :  { %v196_v16 = vpop.f32.mrb[0].mxu1 }
 0x1b5   :  { %v197_v17 = vadd.f32 %v196_v16, %v120_v15  ;;  %v267_v18 = vpop.f32.mrb[1].mxu1 }
 0x1b7   :  { %v200_v19 = vmax.f32 %v197_v17, 0.0 }
 0x1b9   :  { %v207_v21 = vmul.f32 %v205_v20, %v200_v19 }
 0x1bb   :  { %v209_v23 = vsel %vm208_vm4, %v207_v21, 0.0 }
 0x1bc   :  { %v210_v24 = vrot.slane %v209_v23, 4 }
 0x1be   :  { %v211_v25 = vadd.f32 %v210_v24, %v209_v23 }
 0x1c0   :  { %v212_v27 = vrot.slane %v211_v25, 2 }
 0x1c2   :  { %v213_v29 = vadd.f32 %v212_v27, %v211_v25 }
 0x1c4   :  { %v214_v31 = vrot.slane %v213_v29, 1 }
 0x1c6   :  { %v215_v32 = vadd.f32 %v214_v31, %v213_v29 }
 0x1c8   :  { %v226_v34 = vadd.f32 %v225_v33, %v215_v32 }
 0x1ca   :  { %v253_v35 = vmul.f32 -1.442695, %v226_v34 }
 0x1cc   :  { %274 = vpow2.f32 %v253_v35 }
 0x1d6   :  { %v275_v36 = vpop.eup %274 }
 0x1d7   :  { %v230_v37 = vadd.f32 1.0, %v275_v36 }
 0x1d9   :  { %276 = vrcp.f32 %v230_v37 }
 0x1e3   :  { %v277_v38 = vpop.eup %276 }
 0x1e4   :  { %234 = vst.msk [vmem:[#allocation3] sm:$0x1] %vm233_vm5, %v277_v38 }
 0x1e5   :  { %289 = shalt.err (!%p286_p4)
}
 0x1e6   :  { %s290_s14 = scalar_lea.hbm %s388_s7, 16 }
 0x1e7   :  { %p291_p5 = scmp.ne.s32.totalorder %s388_s7, %s290_s14  ;;  %p294_p6 = scmp.lt.u32.totalorder %s290_s14, %s388_s7 }
 0x1e9   :  { %p296_p7 = pnand %p294_p6, %p291_p5 }
 0x1eb   :  { %299 = shalt.err (!%p296_p7)
}
 0x1ec   :  { %244 = dma.vmem_to_hbm [thread:$0]  %s242_s5, 16, %s388_s7, [#allocation4]  }
 0x1ed   :  { %300 = dma.done.wait [#allocation4], 16  }
 0x1ee   :  { %301 = vsyncadd [#allocation4], 4294967280 }
 0x1ef   :  { %248 = vsyncpa [#allocation4], 1 }

</bundles_post_ra>
